<compile_context>
chip_gen: v5e
topology: v5e:2x2
jax: 0.10.0
libtpu: 0.0.40
codegen_flags: <defaults>
</compile_context>

<pallas_src>
import jax
import jax.numpy as jnp
from jax.experimental import pallas as pl
from jax.experimental.pallas import tpu as pltpu

LANES = 128
SUBLANES = 8
TARGET_BLOCK_BYTES = 4 * 1024 * 1024   # ~4 MiB per input block (dtype-aware rows)
VMEM_LIMIT_BYTES = 32 * 1024 * 1024    # 2 inputs x 2 buffers x 4 MiB + headroom


def _round_down(x, m):
    return (x // m) * m


def _round_up(x, m):
    return ((x + m - 1) // m) * m


def _make_kernel(tile_rows, width):
    fold = tile_rows % SUBLANES == 0

    def kernel(pred_ref, gt_ref, out_ref):
        p = pred_ref[...].astype(jnp.float32)
        g = gt_ref[...].astype(jnp.float32)
        d = p - g
        sq = d * d
        if fold:
            # (tile_rows, W) -> (tile_rows//8, 8, W) only splits the sublane dim
            # (free); sum(axis=0) lowers to streaming VPU adds into an (8, W)
            # slab, so the cross-sublane XLU reduce happens once per block.
            slab = sq.reshape(tile_rows // SUBLANES, SUBLANES, width).sum(axis=0)
            lane_sums = jnp.sum(slab, axis=0)           # (W,)
        else:
            # Single (non-8-multiple) full block: direct sublane reduce.
            lane_sums = jnp.sum(sq, axis=0)             # (W,)
        out_ref[...] = lane_sums.reshape(1, 1, width)

    return kernel


def _partial_sq_sum_pallas(p2d, g2d, tile_rows, num_blocks):
    """Sum of (p-g)^2 over the first num_blocks*tile_rows rows of the 2-D views."""
    _, width = p2d.shape
    itemsize = jnp.dtype(p2d.dtype).itemsize
    rows_main = num_blocks * tile_rows
    kernel = _make_kernel(tile_rows, width)
    partials = pl.pallas_call(
        kernel,
        out_shape=jax.ShapeDtypeStruct((num_blocks, 1, width), jnp.float32),
        grid_spec=pltpu.PrefetchScalarGridSpec(
            num_scalar_prefetch=0,
            grid=(num_blocks,),
            in_specs=[
                pl.BlockSpec((tile_rows, width), lambda i: (i, 0)),
                pl.BlockSpec((tile_rows, width), lambda i: (i, 0)),
            ],
            out_specs=pl.BlockSpec((1, 1, width), lambda i: (i, 0, 0)),
        ),
        compiler_params=pltpu.CompilerParams(
            dimension_semantics=("parallel",),
            vmem_limit_bytes=VMEM_LIMIT_BYTES,
        ),
        cost_estimate=pl.CostEstimate(
            flops=3 * rows_main * width,
            transcendentals=0,
            bytes_accessed=2 * rows_main * width * itemsize + num_blocks * width * 4,
        ),
    )(p2d, g2d)
    return jnp.sum(partials, dtype=jnp.float32)


def _sq_sum_f32(a, b):
    d = a.astype(jnp.float32) - b.astype(jnp.float32)
    return jnp.sum(d * d, dtype=jnp.float32)


def _view_plan(shape, itemsize):
    """Decide (statically) how to get a lane-dense 2-D view without O(n) copies."""
    n = 1
    for s in shape:
        n *= s
    if n == 0:
        return "empty", 0
    if n % LANES == 0:
        return "flat128", 0                      # free reshape to (n/128, 128)
    w = shape[-1] if len(shape) >= 2 else 0
    if w >= LANES and _round_up(w, LANES) * itemsize * SUBLANES <= TARGET_BLOCK_BYTES:
        return "lastdim", 0                      # free reshape to (n/w, w)
    rows = n // LANES
    if rows == 0:
        return "tiny", n                         # < 128 elements total
    return "prefix", n - rows * LANES            # small awkward shapes only


@jax.jit
def mse_loss_pallas(pred, gt):
    assert pred.shape == gt.shape, "pred/gt shapes must match"
    ct = jnp.result_type(pred.dtype, gt.dtype)
    if pred.dtype != ct:
        pred = pred.astype(ct)
    if gt.dtype != ct:
        gt = gt.astype(ct)

    n = pred.size
    itemsize = jnp.dtype(ct).itemsize
    plan, tail = _view_plan(pred.shape, itemsize)

    if plan == "empty":
        return jnp.float32(jnp.nan)              # matches torch mean over empty
    if plan == "tiny":
        # < 128 elements: a Pallas launch is pure overhead; do it inline.
        return _sq_sum_f32(pred.reshape(-1), gt.reshape(-1)) / n

    if plan == "flat128":
        width = LANES
        p2d = pred.reshape(-1, LANES)
        g2d = gt.reshape(-1, LANES)
    elif plan == "lastdim":
        width = pred.shape[-1]
        p2d = pred.reshape(-1, width)
        g2d = gt.reshape(-1, width)
    else:  # "prefix": tiny prefix slice (small arrays) + <128-element tail
        width = LANES
        rows_pref = n // LANES
        p2d = pred.reshape(-1)[: rows_pref * LANES].reshape(rows_pref, LANES)
        g2d = gt.reshape(-1)[: rows_pref * LANES].reshape(rows_pref, LANES)

    rows = p2d.shape[0]
    # Dtype-aware tile sizing: keep each input block near TARGET_BLOCK_BYTES,
    # accounting for lane padding of non-128-multiple widths in VMEM.
    width_pad = _round_up(width, LANES)
    tile_cap = max(SUBLANES,
                   _round_down(TARGET_BLOCK_BYTES // (width_pad * itemsize), SUBLANES))
    if rows <= tile_cap:
        num_blocks, tile_rows = 1, rows          # single full-array block
    else:
        num_blocks = -(-rows // tile_cap)        # cdiv
        tile_rows = max(SUBLANES, _round_down(rows // num_blocks, SUBLANES))
    rows_main = num_blocks * tile_rows

    total = _partial_sq_sum_pallas(p2d, g2d, tile_rows, num_blocks)

    if rows_main < rows:
        # Remainder rows (< one tile): tiny slice + XLA reduce keeps the hot
        # kernel loop mask-free and every kernel block full-size.
        total = total + _sq_sum_f32(p2d[rows_main:], g2d[rows_main:])
    if tail:
        p_flat = pred.reshape(-1)
        g_flat = gt.reshape(-1)
        total = total + _sq_sum_f32(p_flat[n - tail:], g_flat[n - tail:])

    return total / n


class MSELossPallas:
    """Mirrors the PyTorch MSELoss module's dict-keyed forward."""

    def __init__(self, output_key: str, target_key: str):
        self.output_key = output_key
        self.target_key = target_key

    def __call__(self, target: dict, predict: dict):
        pred = predict[self.output_key]
        gt = target[self.target_key]
        assert pred.shape == gt.shape
        return mse_loss_pallas(pred, gt)


if __name__ == "__main__":
    key = jax.random.PRNGKey(0)
    loss_fn = MSELossPallas(output_key="out", target_key="gt")

    def check(shape, k, dtype=jnp.float32, rtol=1e-4):
        k1, k2 = jax.random.split(k)
        pred = jax.random.normal(k1, shape, dtype=dtype)
        gt = jax.random.normal(k2, shape, dtype=dtype)
        loss = jax.block_until_ready(loss_fn({"gt": gt}, {"out": pred}))
        ref = jnp.mean((pred.astype(jnp.float32) - gt.astype(jnp.float32)) ** 2)
        assert jnp.allclose(loss, ref, atol=1e-6, rtol=rtol), (shape, loss, ref)

    keys = jax.random.split(key, 5)
    # 1) aligned NCHW (typical module usage): single full block, free reshape
    check((2, 4, 16, 16), keys[0])
    # 2) ragged total + tiny last dim: prefix fallback + <128-elem wrapper tail
    check((3, 5, 7, 11), keys[1])
    # 3) ragged total but lane-friendly last dim: free (700, 1000) view, no pad
    check((1, 1, 700, 1000), keys[2])
    # 4) multi-block aligned: exercises the parallel grid (2 full blocks)
    check((9, 512, 256), keys[3])
    # 5) multi-block with leftover rows: exercises wrapper row-remainder path
    check((8200, 128), keys[4])

    print("KERNEL_OK")
</pallas_src>

<mosaic_0001>
module attributes {stable_mosaic.version = 11 : i64} {
  func.func @kernel(%arg0: i32, %arg1: memref<16x128xf32, #tpu.memory_space<vmem>>, %arg2: memref<16x128xf32, #tpu.memory_space<vmem>>, %arg3: memref<1x1x128xf32, #tpu.memory_space<vmem>>) attributes {dimension_semantics = [#tpu.dimension_semantics<parallel>], iteration_bounds = array<i64: 1>, scalar_prefetch = 0 : i64, scratch_operands = 0 : i64, tpu.core_type = #tpu.core_type<tc>, window_params = [{transform_indices = @transform_0, window_bounds = array<i64: 16, 128>}, {transform_indices = @transform_1, window_bounds = array<i64: 16, 128>}, {transform_indices = @transform_2, window_bounds = array<i64: 1, 1, 128>}]} {
    %c0 = arith.constant 0 : index
    %c0_0 = arith.constant 0 : index
    %0 = vector.load %arg1[%c0, %c0_0] : memref<16x128xf32, #tpu.memory_space<vmem>>, vector<16x128xf32>
    %c0_1 = arith.constant 0 : index
    %c0_2 = arith.constant 0 : index
    %1 = vector.load %arg2[%c0_1, %c0_2] : memref<16x128xf32, #tpu.memory_space<vmem>>, vector<16x128xf32>
    %2 = arith.subf %0, %1 : vector<16x128xf32>
    %3 = arith.mulf %2, %2 : vector<16x128xf32>
    %4 = vector.shape_cast %3 : vector<16x128xf32> to vector<2x8x128xf32>
    %cst = arith.constant dense<0.000000e+00> : vector<8x128xf32>
    %5 = vector.multi_reduction <add>, %4, %cst [0] : vector<2x8x128xf32> to vector<8x128xf32>
    %cst_3 = arith.constant dense<0.000000e+00> : vector<128xf32>
    %6 = vector.multi_reduction <add>, %5, %cst_3 [0] : vector<8x128xf32> to vector<128xf32>
    %7 = vector.shape_cast %6 : vector<128xf32> to vector<1x1x128xf32>
    %c0_4 = arith.constant 0 : index
    %c0_5 = arith.constant 0 : index
    %c0_6 = arith.constant 0 : index
    %8 = vector.load %arg3[%c0_4, %c0_5, %c0_6] : memref<1x1x128xf32, #tpu.memory_space<vmem>>, vector<1x1x128xf32>
    tpu.vector_store %arg3[%c0_4, %c0_5, %c0_6], %7 {strides = array<i32>} : memref<1x1x128xf32, #tpu.memory_space<vmem>>, vector<1x1x128xf32>,
    return
  }
  func.func @transform_0(%arg0: i32) -> (i32, i32) {
    %c0_i32 = arith.constant 0 : i32
    %c0_i32_0 = arith.constant 0 : i32
    return %arg0, %c0_i32 : i32, i32
  }
  func.func @transform_1(%arg0: i32) -> (i32, i32) {
    %c0_i32 = arith.constant 0 : i32
    %c0_i32_0 = arith.constant 0 : i32
    return %arg0, %c0_i32 : i32, i32
  }
  func.func @transform_2(%arg0: i32) -> (i32, i32, i32) {
    %c0_i32 = arith.constant 0 : i32
    %c0_i32_0 = arith.constant 0 : i32
    %c0_i32_1 = arith.constant 0 : i32
    return %arg0, %c0_i32, %c0_i32_0 : i32, i32, i32
  }
}

</mosaic_0001>

<bundles_post_ra>
// kernel: mse_loss_pallas.1
= control target key start
LH: loop header
LB: loop body
LE: loop exit
PB: predicated region body
PF: predicated region fallthrough
CT: control target
= control target key end

     0   :  { %s61_s0 = inlined_call_operand.vmem [shape: f32[16,128], index: 0, kind: input, shape index: {}]   ;;  %s62_s1 = inlined_call_operand.vmem [shape: f32[16,128], index: 1, kind: input, shape index: {}]   ;;  %s63_s2 = inlined_call_operand.vmem [shape: f32[1,1,128], index: 2, kind: output, shape index: {}]  }
   0x1   :  { %v11_v0 = vld [vmem:[%s61_s0] sm:$0xff]  ;;  %v12_v1 = vld [vmem:[%s61_s0 + $0x8] sm:$0xff] }
   0x2   :  { %v13_v2 = vld [vmem:[%s62_s1] sm:$0xff]  ;;  %v14_v3 = vld [vmem:[%s62_s1 + $0x8] sm:$0xff] }
   0x3   :  { %v15_v4 = vsub.f32 %v11_v0, %v13_v2  ;;  %v16_v5 = vsub.f32 %v12_v1, %v14_v3 }
   0x5   :  { %v17_v6 = vmul.f32 %v15_v4, %v15_v4  ;;  %v18_v7 = vmul.f32 %v16_v5, %v16_v5 }
   0x7   :  { %v19_v8 = vadd.f32 %v18_v7, %v17_v6 }
   0x9   :  { %v20_v9 = vrot.slane %v19_v8, 4 }
   0xb   :  { %v21_v10 = vadd.f32 %v20_v9, %v19_v8 }
   0xd   :  { %v22_v11 = vrot.slane %v21_v10, 2 }
   0xf   :  { %v23_v12 = vadd.f32 %v22_v11, %v21_v10 }
  0x11   :  { %v24_v13 = vrot.slane %v23_v12, 1 }
  0x13   :  { %v25_v14 = vadd.f32 %v24_v13, %v23_v12 }
  0x15   :  { %26 = vst [vmem:[%s63_s2] sm:$0x1] %v25_v14 }

</bundles_post_ra>
